<compile_context>
chip_gen: v6e
topology: v6e:2x2x1
jax: 0.10.0
libtpu: 0.0.40
codegen_flags: <defaults>
</compile_context>

<pallas_src>
import functools
import math
import numpy as np

import jax
import jax.numpy as jnp
from jax.experimental import pallas as pl
from jax.experimental.pallas import tpu as pltpu


# ----------------------------------------------------------------------------
# Fused evaluator kernel:
#   mean over frames -> W1_global half (+ b1)
#   PositionalEmbedding (pe @ W1 precomputed) + frame @ W1_frame half
#   -> ReLU -> Linear(D, 1)  [-> optional per-sequence min/max normalization]
# ----------------------------------------------------------------------------
def evaluator_score_kernel(x_ref, pe_ref, w1f_ref, w1g_ref, b1_ref, w2_ref,
                           out_ref, *, normalize):
    """
    x_ref  : (Bb, S, D)  f32   frame features (whole sequences per block)
    pe_ref : (S,  D)     f32   pe @ W1                     (precomputed, resident)
    w1f_ref: (D,  D)     bf16  frame half of Linear(2D, D) weight (resident)
    w1g_ref: (D,  D)     f32   global half of Linear(2D, D) weight (resident)
    b1_ref : (1,  D)     f32   Linear(2D, D) bias (resident)
    w2_ref : (1,  D)     f32   Linear(D, 1) weight as a row (resident)
    out_ref: (Bb, S)     f32   per-frame score (optionally normalized)
    """
    bb, s_len, d = x_ref.shape
    x = x_ref[...]                                                    # (Bb, S, D) f32

    # Global term: per-sequence mean over frames (f32, matches the reference),
    # then the "global" half of W1 plus b1.  Small (Bb, D) @ (D, D) MXU matmul.
    mean_x = jnp.mean(x, axis=1)                                      # (Bb, D)
    g = jnp.dot(mean_x, w1g_ref[...],
                preferred_element_type=jnp.float32) + b1_ref[...]    # (Bb, D)

    # Frame term: single D-wide MXU contraction, bf16 inputs / f32 accumulation.
    # The (Bb, S, D) -> (Bb*S, D) collapse is a layout-free re-view when
    # S % 8 == 0 (sublane tiling); otherwise Mosaic inserts a VMEM relayout.
    x2d = x.astype(jnp.bfloat16).reshape(bb * s_len, d)
    h = jnp.dot(x2d, w1f_ref[...], preferred_element_type=jnp.float32)
    h = h.reshape(bb, s_len, d)

    # (x + pe) @ W1_frame + mean-term + b1, ReLU — all f32 elementwise on the VPU.
    h = jnp.maximum(h + pe_ref[...][None, :, :] + g[:, None, :], 0.0)

    # Linear(D, 1) as a VPU multiply + lane reduction (avoids an N=1 MXU matmul).
    # b2 is intentionally dropped: it cancels in the normalization and cannot
    # change the top-k ordering.
    score = jnp.sum(h * w2_ref[...], axis=-1)                         # (Bb, S)

    if normalize:
        s_min = jnp.min(score, axis=-1, keepdims=True)
        s_max = jnp.max(score, axis=-1, keepdims=True)
        score = (score - s_min) * pl.reciprocal(s_max - s_min + 1e-4, approx=True)

    out_ref[...] = score


def _pick_batch_block(B, S, D, *, target_rows=1024, vmem_budget_bytes=24 << 20,
                      min_grid_steps=2):
    """How many whole sequences go into one grid step.

    Whole sequences must stay inside a block so the per-sequence mean / min /
    max can be computed in-kernel.  The budget accounts for the double-buffered
    f32 x block, the in-kernel bf16 copy, the f32 h intermediate (+ one
    elementwise temporary) and the resident weight operands.  Defaults are
    sized for v7x (64 MiB physical / 32 MiB scoped VMEM); on v5e/v6e raise
    vmem_budget_bytes (and vmem_limit_bytes in the caller) to use the 128 MiB.
    The grid is kept to >= min_grid_steps steps when possible so both v7x
    TensorCores get work and the BlockSpec pipeline has something to overlap.
    The (Bb, S) output block obeys the (8,128) rule via Bb == B or Bb % 8 == 0.
    """
    resident = 2 * (S * D * 4            # pe_proj (f32)
                    + D * D * 2          # W1 frame half (bf16)
                    + D * D * 4          # W1 global half (f32)
                    + 2 * D * 4)         # b1 + w2 rows
    per_seq = (2 * S * D * 4             # streamed f32 x block, double-buffered
               + S * D * 2               # in-kernel bf16 copy for the MXU
               + 2 * S * D * 4           # f32 h + one elementwise temporary
               + 4 * S * 4)              # score / double-buffered output
    budget = max(per_seq, vmem_budget_bytes - resident)
    cap = min(B,
              max(1, budget // per_seq),
              max(1, target_rows // S),
              max(1, B // min_grid_steps))
    for bb in range(cap, 0, -1):
        if B % bb == 0 and (bb == B or bb % 8 == 0):
            return bb
    # No multi-step split satisfies the tiling rule (e.g. B < 16): single block.
    return B


def prepare_sampler_params(params):
    """One-time, call-invariant precompute.  Do NOT redo this per forward."""
    w1 = params["w1"]                                     # (2D, D)
    D = w1.shape[1]
    pe_proj = jnp.dot(params["pe"], w1,
                      precision=jax.lax.Precision.HIGHEST)            # (S, D)
    return {
        "pe_proj": pe_proj.astype(jnp.float32),
        "w1_frame_bf16": w1[:D].astype(jnp.bfloat16),     # (D, D) frame half
        "w1_global": w1[D:].astype(jnp.float32),          # (D, D) global half
        "b1": params["b1"].reshape(1, D).astype(jnp.float32),
        "w2_row": params["w2"].reshape(1, D).astype(jnp.float32),
        # b2 is dropped on purpose (exact no-op for normalization and top-k).
    }


def evaluator_scores(feature, prepared, *, normalize=True, batch_block=None,
                     vmem_budget_bytes=24 << 20, vmem_limit_bytes=32 << 20):
    """feature: (B, S, D) f32.  Returns per-frame scores (B, S)."""
    B, S, D = feature.shape
    bb = batch_block if batch_block is not None else _pick_batch_block(
        B, S, D, vmem_budget_bytes=vmem_budget_bytes)
    assert B % bb == 0 and (bb == B or bb % 8 == 0), (
        f"batch block {bb} violates the (8,128) tiling rule for the (bb, S) "
        f"output block (need bb == B or bb % 8 == 0 and bb | B)")
    grid = (B // bb,)

    kernel = functools.partial(evaluator_score_kernel, normalize=normalize)

    # TODO(synk): if a profile shows exposed DMA on the x stream (the only
    #             streamed operand), add pipeline_mode=pl.Buffered(3) below.
    return pl.pallas_call(
        kernel,
        out_shape=jax.ShapeDtypeStruct((B, S), jnp.float32),
        grid=grid,
        in_specs=[
            pl.BlockSpec((bb, S, D), lambda i: (i, 0, 0)),   # frame features (streamed)
            pl.BlockSpec((S, D), lambda i: (0, 0)),          # pe @ W1 (resident)
            pl.BlockSpec((D, D), lambda i: (0, 0)),          # W1 frame half, bf16
            pl.BlockSpec((D, D), lambda i: (0, 0)),          # W1 global half, f32
            pl.BlockSpec((1, D), lambda i: (0, 0)),          # b1 row
            pl.BlockSpec((1, D), lambda i: (0, 0)),          # W2 row
        ],
        out_specs=pl.BlockSpec((bb, S), lambda i: (i, 0)),
        compiler_params=pltpu.CompilerParams(
            dimension_semantics=("parallel",),               # shards over v7x's 2 TCs
            vmem_limit_bytes=vmem_limit_bytes),
    )(feature, prepared["pe_proj"], prepared["w1_frame_bf16"],
      prepared["w1_global"], prepared["b1"], prepared["w2_row"])


# ----------------------------------------------------------------------------
# Wrapper: full Sampler.forward (eval, ada=False, shot=1)
# ----------------------------------------------------------------------------
def sampler_forward(x, prepared, *, seq_len, k, batch_block=None):
    """x: (B, D, S) f32 (pre-transpose layout, as handed to the nn.Module).

    Returns (indices, selected_feature, feature).
    """
    B, D, S = x.shape
    assert S == seq_len

    # feature = x.transpose(-1, -2); it is a return value and the gather source,
    # so the transpose is materialized exactly once here.
    # TODO(synk): feed the kernel x in its native (B, D, S) layout (dot_general
    #             contracting D) so scoring does not serialize behind this transpose.
    feature = jnp.transpose(x, (0, 2, 1))                      # (B, S, D)

    # top_k is invariant to the per-sequence positive affine normalization and
    # to the dropped b2, so the kernel skips the min/max epilogue on this path.
    score = evaluator_scores(feature, prepared, normalize=False,
                             batch_block=batch_block)

    # fast_topk: topk -> sort indices -> one_hot.  Top-k / sort have no clean
    # Pallas equivalent, so the index bookkeeping stays in plain JAX.
    # NOTE: lax.top_k tie-breaking can differ from torch.topk on exact ties.
    _, top_idx = jax.lax.top_k(score, k)                       # (B, k)
    top_idx = jnp.sort(top_idx, axis=-1)
    indices = jax.nn.one_hot(top_idx, S, dtype=jnp.float32)    # (B, k, S), API parity

    # torch.bmm(indices, feature) just moves k rows: do an O(B*k*D) row gather
    # instead of streaming a mostly-zero (B, k, S) matrix through the MXU.
    selected = jnp.take_along_axis(feature, top_idx[..., None], axis=1)  # (B, k, D)

    return indices, selected, feature


# ----------------------------------------------------------------------------
# Pure-JAX reference (mirrors the PyTorch module exactly, f32 throughout)
# ----------------------------------------------------------------------------
def reference_norm_scores(feature, params):
    B, S, D = feature.shape
    info_g = jnp.broadcast_to(jnp.mean(feature, axis=1, keepdims=True), (B, S, D))
    xcat = jnp.concatenate([feature, info_g], axis=-1)          # (B, S, 2D)
    x = xcat + params["pe"][None]                               # PositionalEmbedding
    h = jnp.maximum(x @ params["w1"] + params["b1"], 0.0)       # Linear(2D, D) + ReLU
    s = (h @ params["w2"])[..., 0] + params["b2"][0, 0]         # Linear(D, 1)
    s_min = jnp.min(s, axis=-1, keepdims=True)
    s_max = jnp.max(s, axis=-1, keepdims=True)
    return (s - s_min) / (s_max - s_min + 1e-4)


# ----------------------------------------------------------------------------
# Deterministic parameter construction (mirrors nn.Linear / PositionalEmbedding)
# ----------------------------------------------------------------------------
def make_params(D, seq_len, key):
    d_model = 2 * D
    pos = np.arange(seq_len, dtype=np.float32)[:, None]
    div = np.exp(np.arange(0, d_model, 2, dtype=np.float32)
                 * -(math.log(10000.0) / d_model))
    pe = np.zeros((seq_len, d_model), dtype=np.float32)
    pe[:, 0::2] = np.sin(pos * div)
    pe[:, 1::2] = np.cos(pos * div)

    k1, k2, k3, k4 = jax.random.split(key, 4)
    bound1 = 1.0 / math.sqrt(d_model)
    bound2 = 1.0 / math.sqrt(D)
    return {
        "pe": jnp.asarray(pe),                                               # (S, 2D)
        "w1": jax.random.uniform(k1, (d_model, D), jnp.float32, -bound1, bound1),
        "b1": jax.random.uniform(k2, (1, D), jnp.float32, -bound1, bound1),
        "w2": jax.random.uniform(k3, (D, 1), jnp.float32, -bound2, bound2),
        "b2": jax.random.uniform(k4, (1, 1), jnp.float32, -bound2, bound2),
    }


if __name__ == "__main__":
    # Small config consistent with the module:
    #   trans_linear_in_dim D=32, sampler_seq_len S=16, k=4, shot=1, ada=False.
    B, D, S, K = 2, 32, 16, 4

    key = jax.random.PRNGKey(0)
    kx, kp = jax.random.split(key)
    x = jax.random.normal(kx, (B, D, S), dtype=jnp.float32)   # (B, D, S) layout
    params = make_params(D, S, kp)
    prepared = prepare_sampler_params(params)                 # call-invariant precompute

    indices, selected_feature, feature = sampler_forward(x, prepared, seq_len=S, k=K)
    jax.block_until_ready((indices, selected_feature, feature))

    # Shape checks (module API: indices (B,k,S) one-hot, selected (B,k,D), feature (B,S,D))
    assert indices.shape == (B, K, S)
    assert selected_feature.shape == (B, K, D)
    assert feature.shape == (B, S, D)
    assert np.allclose(np.asarray(indices).sum(-1), 1.0)

    # The gather must reproduce torch.bmm(indices, feature) exactly.
    sel_ref = jnp.einsum("bks,bsd->bkd", indices, feature)
    np.testing.assert_allclose(np.asarray(selected_feature), np.asarray(sel_ref),
                               atol=1e-6, rtol=0)

    # Numeric check of the fused Pallas evaluator (normalized path) against the
    # pure-JAX reference (loose tolerance absorbs bf16 MXU inputs + approx recip).
    got = evaluator_scores(feature, prepared, normalize=True)
    want = reference_norm_scores(feature, params)
    np.testing.assert_allclose(np.asarray(got), np.asarray(want), atol=5e-2, rtol=0)

    print("KERNEL_OK")
</pallas_src>

<mosaic_0001>
module attributes {stable_mosaic.version = 11 : i64} {
  func.func @evaluator_score_kernel(%arg0: i32, %arg1: memref<2x16x32xf32, #tpu.memory_space<vmem>>, %arg2: memref<16x32xf32, #tpu.memory_space<vmem>>, %arg3: memref<32x32xbf16, #tpu.memory_space<vmem>>, %arg4: memref<32x32xf32, #tpu.memory_space<vmem>>, %arg5: memref<1x32xf32, #tpu.memory_space<vmem>>, %arg6: memref<1x32xf32, #tpu.memory_space<vmem>>, %arg7: memref<2x16xf32, #tpu.memory_space<vmem>>) attributes {dimension_semantics = [#tpu.dimension_semantics<parallel>], iteration_bounds = array<i64: 1>, scalar_prefetch = 0 : i64, scratch_operands = 0 : i64, tpu.core_type = #tpu.core_type<tc>, window_params = [{transform_indices = @transform_0, window_bounds = array<i64: 2, 16, 32>}, {pipeline_mode = #tpu.pipeline_mode<synchronous>, transform_indices = @transform_1, window_bounds = array<i64: 16, 32>}, {pipeline_mode = #tpu.pipeline_mode<synchronous>, transform_indices = @transform_2, window_bounds = array<i64: 32, 32>}, {pipeline_mode = #tpu.pipeline_mode<synchronous>, transform_indices = @transform_3, window_bounds = array<i64: 32, 32>}, {pipeline_mode = #tpu.pipeline_mode<synchronous>, transform_indices = @transform_4, window_bounds = array<i64: 1, 32>}, {pipeline_mode = #tpu.pipeline_mode<synchronous>, transform_indices = @transform_5, window_bounds = array<i64: 1, 32>}, {transform_indices = @transform_6, window_bounds = array<i64: 2, 16>}]} {
    %c0 = arith.constant 0 : index
    %c0_0 = arith.constant 0 : index
    %c0_1 = arith.constant 0 : index
    %0 = vector.load %arg1[%c0, %c0_0, %c0_1] : memref<2x16x32xf32, #tpu.memory_space<vmem>>, vector<2x16x32xf32>
    %cst = arith.constant dense<0.000000e+00> : vector<2x32xf32>
    %1 = vector.multi_reduction <add>, %0, %cst [1] : vector<2x16x32xf32> to vector<2x32xf32>
    %cst_2 = arith.constant 1.600000e+01 : f32
    %2 = vector.broadcast %cst_2 : f32 to vector<2x32xf32>
    %3 = arith.divf %1, %2 : vector<2x32xf32>
    %c0_3 = arith.constant 0 : index
    %c0_4 = arith.constant 0 : index
    %4 = vector.load %arg4[%c0_3, %c0_4] : memref<32x32xf32, #tpu.memory_space<vmem>>, vector<32x32xf32>
    %cst_5 = arith.constant dense<0.000000e+00> : vector<2x32xf32>
    %5 = tpu.matmul %3, %4, %cst_5 {dimension_numbers = #tpu.dot_dimension_numbers<[1], [0], [0], [1], [0, 0, 1, 1], [], []>} : vector<2x32xf32>, vector<32x32xf32>, vector<2x32xf32> -> vector<2x32xf32>
    %c0_6 = arith.constant 0 : index
    %c0_7 = arith.constant 0 : index
    %6 = vector.load %arg5[%c0_6, %c0_7] : memref<1x32xf32, #tpu.memory_space<vmem>>, vector<1x32xf32>
    %7 = vector.broadcast %6 : vector<1x32xf32> to vector<2x32xf32>
    %8 = arith.addf %5, %7 : vector<2x32xf32>
    %9 = arith.truncf %0 : vector<2x16x32xf32> to vector<2x16x32xbf16>
    %10 = vector.shape_cast %9 : vector<2x16x32xbf16> to vector<32x32xbf16>
    %c0_8 = arith.constant 0 : index
    %c0_9 = arith.constant 0 : index
    %11 = vector.load %arg3[%c0_8, %c0_9] : memref<32x32xbf16, #tpu.memory_space<vmem>>, vector<32x32xbf16>
    %cst_10 = arith.constant dense<0.000000e+00> : vector<32x32xf32>
    %12 = tpu.matmul %10, %11, %cst_10 {dimension_numbers = #tpu.dot_dimension_numbers<[1], [0], [0], [1], [0, 0, 1, 1], [], []>} : vector<32x32xbf16>, vector<32x32xbf16>, vector<32x32xf32> -> vector<32x32xf32>
    %13 = vector.shape_cast %12 : vector<32x32xf32> to vector<2x16x32xf32>
    %c0_11 = arith.constant 0 : index
    %c0_12 = arith.constant 0 : index
    %14 = vector.load %arg2[%c0_11, %c0_12] : memref<16x32xf32, #tpu.memory_space<vmem>>, vector<16x32xf32>
    %15 = vector.shape_cast %14 : vector<16x32xf32> to vector<1x16x32xf32>
    %16 = vector.broadcast %15 : vector<1x16x32xf32> to vector<2x16x32xf32>
    %17 = arith.addf %13, %16 : vector<2x16x32xf32>
    %18 = vector.shape_cast %8 : vector<2x32xf32> to vector<2x1x32xf32>
    %19 = vector.broadcast %18 : vector<2x1x32xf32> to vector<2x16x32xf32>
    %20 = arith.addf %17, %19 : vector<2x16x32xf32>
    %cst_13 = arith.constant 0.000000e+00 : f32
    %21 = vector.broadcast %cst_13 : f32 to vector<2x16x32xf32>
    %22 = arith.maximumf %20, %21 : vector<2x16x32xf32>
    %c0_14 = arith.constant 0 : index
    %c0_15 = arith.constant 0 : index
    %23 = vector.load %arg6[%c0_14, %c0_15] : memref<1x32xf32, #tpu.memory_space<vmem>>, vector<1x32xf32>
    %24 = vector.shape_cast %23 : vector<1x32xf32> to vector<1x1x32xf32>
    %25 = vector.broadcast %24 : vector<1x1x32xf32> to vector<2x16x32xf32>
    %26 = arith.mulf %22, %25 : vector<2x16x32xf32>
    %cst_16 = arith.constant dense<0.000000e+00> : vector<2x16xf32>
    %27 = vector.multi_reduction <add>, %26, %cst_16 [2] : vector<2x16x32xf32> to vector<2x16xf32>
    %c0_17 = arith.constant 0 : index
    %c0_18 = arith.constant 0 : index
    %28 = vector.load %arg7[%c0_17, %c0_18] : memref<2x16xf32, #tpu.memory_space<vmem>>, vector<2x16xf32>
    tpu.vector_store %arg7[%c0_17, %c0_18], %27 {strides = array<i32>} : memref<2x16xf32, #tpu.memory_space<vmem>>, vector<2x16xf32>,
    return
  }
  func.func @transform_0(%arg0: i32) -> (i32, i32, i32) {
    %c0_i32 = arith.constant 0 : i32
    %c0_i32_0 = arith.constant 0 : i32
    %c0_i32_1 = arith.constant 0 : i32
    return %arg0, %c0_i32, %c0_i32_0 : i32, i32, i32
  }
  func.func @transform_1(%arg0: i32) -> (i32, i32) {
    %c0_i32 = arith.constant 0 : i32
    %c0_i32_0 = arith.constant 0 : i32
    %c0_i32_1 = arith.constant 0 : i32
    return %c0_i32, %c0_i32_0 : i32, i32
  }
  func.func @transform_2(%arg0: i32) -> (i32, i32) {
    %c0_i32 = arith.constant 0 : i32
    %c0_i32_0 = arith.constant 0 : i32
    %c0_i32_1 = arith.constant 0 : i32
    return %c0_i32, %c0_i32_0 : i32, i32
  }
  func.func @transform_3(%arg0: i32) -> (i32, i32) {
    %c0_i32 = arith.constant 0 : i32
    %c0_i32_0 = arith.constant 0 : i32
    %c0_i32_1 = arith.constant 0 : i32
    return %c0_i32, %c0_i32_0 : i32, i32
  }
  func.func @transform_4(%arg0: i32) -> (i32, i32) {
    %c0_i32 = arith.constant 0 : i32
    %c0_i32_0 = arith.constant 0 : i32
    %c0_i32_1 = arith.constant 0 : i32
    return %c0_i32, %c0_i32_0 : i32, i32
  }
  func.func @transform_5(%arg0: i32) -> (i32, i32) {
    %c0_i32 = arith.constant 0 : i32
    %c0_i32_0 = arith.constant 0 : i32
    %c0_i32_1 = arith.constant 0 : i32
    return %c0_i32, %c0_i32_0 : i32, i32
  }
  func.func @transform_6(%arg0: i32) -> (i32, i32) {
    %c0_i32 = arith.constant 0 : i32
    %c0_i32_0 = arith.constant 0 : i32
    return %arg0, %c0_i32 : i32, i32
  }
}

</mosaic_0001>

<bundles_post_ra>
// kernel: tpu_custom_call.1
= control target key start
LH: loop header
LB: loop body
LE: loop exit
PB: predicated region body
PF: predicated region fallthrough
CT: control target
= control target key end

     0   :  { %11 = vsyncpa [#allocation3], 0  ;;  %s630_s0 = inlined_call_operand.hbm [shape: f32[2,16,32], index: 0, kind: input, shape index: {}]   ;;  %s631_s1 = inlined_call_operand.hbm [shape: f32[16,32], index: 1, kind: input, shape index: {}]   ;;  %s632_s2 = inlined_call_operand.hbm [shape: bf16[32,32], index: 2, kind: input, shape index: {}]   ;;  %s633_s3 = inlined_call_operand.hbm [shape: f32[32,32], index: 3, kind: input, shape index: {}]   ;;  %s634_s4 = inlined_call_operand.vmem [shape: f32[1,32], index: 4, kind: input, shape index: {}]   ;;  %s635_s5 = inlined_call_operand.vmem [shape: f32[1,32], index: 5, kind: input, shape index: {}]   ;;  %s636_s6 = inlined_call_operand.hbm [shape: f32[2,16], index: 6, kind: output, shape index: {}]  }
   0x1   :  { %12 = vsyncpa [#allocation6], 0 }
   0x2   :  { %13 = vsyncpa [#allocation9], 0 }
   0x3   :  { %14 = vsyncpa [#allocation4], 0  ;;  %s540_s21 = smov [#allocation5]   ;;  %s541_s23 = smov [#allocation2]  }
   0x4   :  { %s32_s22 = sshll.u32 %s540_s21, 4  ;;  %s20_s24 = sshll.u32 %s541_s23, 4  ;;  %s33_s22 = int_to_ptr.vmem [resolvable:$true] %s32_s22  ;;  %s21_s24 = int_to_ptr.vmem [resolvable:$true] %s20_s24 }
   0x5   :  { %s440_s25 = scalar_lea.vmem %s33_s22, 256  ;;  %p445_p1 = scmp.lt.s32.totalorder %s33_s22, %s33_s22 }
   0x6   :  { %p441_p0 = scmp.ne.s32.totalorder %s33_s22, %s440_s25  ;;  %p446_p2 = scmp.lt.s32.totalorder %s440_s25, %s440_s25 }
   0x8   :  { %p447_p3 = por %p446_p2, %p445_p1 }
   0xa   :  { %p448_p4 = pnand %p447_p3, %p441_p0 }
   0xc   :  { %451 = shalt.err (!%p448_p4)
}
   0xd   :  { %s542_s26 = smov 128   ;;  %s543_s27 = smov 8  }
   0xe   :  { %38 = dma.hbm_to_vmem [thread:$0]  %s631_s1, 256, %s33_s22, [#allocation6], %s542_s26, %s542_s26, %s543_s27  }
   0xf   :  { %s460_s30 = scalar_lea.vmem %s21_s24, 512  ;;  %p465_p6 = scmp.lt.s32.totalorder %s21_s24, %s21_s24 }
  0x10   :  { %p461_p5 = scmp.ne.s32.totalorder %s21_s24, %s460_s30  ;;  %p466_p7 = scmp.lt.s32.totalorder %s460_s30, %s460_s30 }
  0x12   :  { %p467_p8 = por %p466_p7, %p465_p6 }
  0x14   :  { %p468_p9 = pnand %p467_p8, %p461_p5 }
  0x16   :  { %471 = shalt.err (!%p468_p9)
}
  0x17   :  { %26 = dma.hbm_to_vmem [thread:$0]  %s630_s0, 512, %s21_s24, [#allocation3], %s542_s26, %s542_s26, %s543_s27  }
  0x18   :  { %s544_s9 = smov [#allocation7]  }
  0x19   :  { %s44_s10 = sshll.u32 %s544_s9, 4  ;;  %s45_s10 = int_to_ptr.vmem [resolvable:$true] %s44_s10 }
  0x1a   :  { %s480_s11 = scalar_lea.vmem %s45_s10, 256  ;;  %p485_p11 = scmp.lt.s32.totalorder %s45_s10, %s45_s10 }
  0x1b   :  { %p481_p10 = scmp.ne.s32.totalorder %s45_s10, %s480_s11  ;;  %p486_p12 = scmp.lt.s32.totalorder %s480_s11, %s480_s11 }
  0x1d   :  { %p487_p13 = por %p486_p12, %p485_p11 }
  0x1f   :  { %p488_p0 = pnand %p487_p13, %p481_p10 }
  0x21   :  { %491 = shalt.err (!%p488_p0)
}
  0x22   :  { %s545_s1 = smov 64   ;;  %s546_s12 = smov 4  }
  0x23   :  { %50 = dma.hbm_to_vmem [thread:$0]  %s632_s2, 256, %s45_s10, [#allocation6], %s545_s1, %s545_s1, %s546_s12  }
  0x24   :  { %s547_s15 = smov [#allocation8]  }
  0x25   :  { %s56_s16 = sshll.u32 %s547_s15, 4  ;;  %s57_s16 = int_to_ptr.vmem [resolvable:$true] %s56_s16 }
  0x26   :  { %s500_s0 = scalar_lea.vmem %s57_s16, 512  ;;  %p505_p2 = scmp.lt.s32.totalorder %s57_s16, %s57_s16 }
  0x27   :  { %p501_p1 = scmp.ne.s32.totalorder %s57_s16, %s500_s0  ;;  %p506_p3 = scmp.lt.s32.totalorder %s500_s0, %s500_s0 }
  0x29   :  { %p507_p4 = por %p506_p3, %p505_p2 }
  0x2b   :  { %p508_p5 = pnand %p507_p4, %p501_p1 }
  0x2d   :  { %511 = shalt.err (!%p508_p5)
}
  0x2e   :  { %62 = dma.hbm_to_vmem [thread:$0]  %s633_s3, 512, %s57_s16, [#allocation9], %s542_s26, %s542_s26, %s543_s27  }
  0x2f   :  { %532 = dma.done.wait [#allocation3], 512  }
  0x30   :  { %533 = vsyncadd [#allocation3], 4294966784 }
  0x31   :  { %534 = dma.done.wait [#allocation6], 512  }
  0x32   :  { %535 = vsyncadd [#allocation6], 4294966784 }
  0x33   :  { %536 = dma.done.wait [#allocation9], 512  }
  0x34   :  { %537 = vsyncadd [#allocation9], 4294966784  ;;  %v548_v0 = vmov 0.0   ;;  %vm549_vm0 = vmmov 0   ;;  %v430_v1 = vld [vmem:[#allocation7 + $0x8] sm:$0xff]   ;;  %v108_v3 = vld [vmem:[#allocation8 + $0x10] sm:$0xff]  ;;  %v276_v37 = vlaneseq }
  0x35   :  { %399 = vmatprep.subr.mxu0 %v548_v0  ;;  %407 = vmatprep.mubr.msk.f32.mxu0 %vm549_vm0, %v548_v0  ;;  %v109_v2 = vld [vmem:[#allocation8 + $0x18] sm:$0xff]  ;;  %vm84_vm1 = vcmask 261120   ;;  %v431_v4 = vld [vmem:[#allocation7] sm:$0xff]   ;;  %v107_v5 = vld [vmem:[#allocation8 + $0x8] sm:$0xff]  ;;  %vm119_vm2 = vcmask 1041409   ;;  %vm351_vm3 = vcmask 130112  }
  0x36   :  { %410 = vmatprep.subr.bf16.mxu1 %v430_v1  ;;  %400 = vmatpush3.msra.mxu0 %v109_v2  ;;  %v80_v6 = vld [vmem:[#allocation2] sm:$0xff]  ;;  %v81_v7 = vld [vmem:[#allocation2 + $0x8] sm:$0xff]  ;;  %v82_v11 = vld [vmem:[#allocation2 + $0x10] sm:$0xff]  ;;  %v550_v35 = vmov 1966171168   ;;  %v277_v40 = vshrl.u32 %v276_v37, 7 }
  0x37   :  { %411 = vmatpush3.bf16.msra.mxu1 %v430_v1  ;;  %401 = vmatprep.subr.mxu0 %v548_v0  ;;  %v85_v8 = vsel %vm84_vm1, %v80_v6, 0.0  ;;  %v86_v9 = vsel %vm84_vm1, %v81_v7, 0.0  ;;  %v193_v10 = vpack.c.bf16 %v81_v7, %v80_v6  ;;  %v83_v12 = vld [vmem:[#allocation2 + $0x18] sm:$0xff]  ;;  %v106_v13 = vld [vmem:[#allocation8] sm:$0xff]  ;;  %v94_v15 = vsel %vm84_vm1, %v82_v11, 0.0  ;;  %v267_v48 = vld [vmem:[#allocation5 + $0x8] sm:$0xff] }
  0x38   :  { %402 = vmatpush3.msra.mxu0 %v108_v3  ;;  %412 = vmatprep.subr.bf16.mxu1 %v431_v4  ;;  %v87_v14 = vadd.f32 %v86_v9, %v85_v8  ;;  %v95_v16 = vsel %vm84_vm1, %v83_v12, 0.0  ;;  %v194_v18 = vpack.c.bf16 %v83_v12, %v82_v11  ;;  %v274_v36 = vunpack.c.l.s4 %v550_v35  ;;  %v383_v41 = vld [vmem:[%s634_s4] ss:$0 sm:$0xff] }
  0x39   :  { %403 = vmatprep.subr.mxu0 %v548_v0  ;;  %414 = vmatprep.mubr.msk.bf16.mxu1 %vm84_vm1, %v193_v10  ;;  %v96_v17 = vadd.f32 %v95_v16, %v94_v15  ;;  %v266_v46 = vld [vmem:[#allocation5] sm:$0xff]  ;;  %v297_v51 = vsub.s32 0, %v277_v40  ;;  %vm364_vm4 = vcmask 123904  }
  0x3a   :  { %404 = vmatpush3.msra.mxu0 %v107_v5  ;;  %v88_v19 = vrot.slane %v87_v14, 4  ;;  %v275_v39 = vunpack.c.0.s8 %v274_v36  ;;  %v389_v63 = vld [vmem:[%s635_s5] ss:$0 sm:$0xff]  ;;  %s551_s5 = smov [#allocation10]  }
  0x3b   :  { %413 = vmatpush3.bf16.msra.mxu1 %v431_v4  ;;  %405 = vmatprep.subr.mxu0 %v548_v0  ;;  %v97_v20 = vrot.slane %v96_v17, 4  ;;  %s372_s20 = sshll.u32 %s551_s5, 4  ;;  %s373_s20 = int_to_ptr.vmem [resolvable:$true] %s372_s20 }
  0x3c   :  { %406 = vmatpush3.msra.mxu0 %v106_v13  ;;  %v89_v21 = vadd.f32 %v88_v19, %v87_v14  ;;  %v278_v43 = vsub.s32 %v275_v39, %v277_v40  ;;  %v341_v14 = vand.u32 127, %v276_v37  ;;  %s512_s21 = scalar_lea.vmem %s373_s20, 32  ;;  %p517_p7 = scmp.lt.s32.totalorder %s373_s20, %s373_s20 }
  0x3d   :  { %v98_v22 = vadd.f32 %v97_v20, %v96_v17  ;;  %p513_p6 = scmp.ne.s32.totalorder %s373_s20, %s512_s21  ;;  %p518_p8 = scmp.lt.s32.totalorder %s512_s21, %s512_s21 }
  0x3e   :  { %415 = vmatmul.mubr.msk.bf16.vlgmr.msra.gmra.mxu1 %vm84_vm1, %v194_v18  ;;  %v90_v23 = vrot.slane %v89_v21, 2  ;;  %v346_v15 = vadd.s32 4294967288, %v341_v14  ;;  %v344_v19 = vsub.s32 %v341_v14, %v277_v40 }
  0x3f   :  { %v99_v24 = vrot.slane %v98_v22, 2  ;;  %p519_p9 = por %p518_p8, %p517_p7 }
  0x40   :  { %v91_v25 = vadd.f32 %v90_v23, %v89_v21  ;;  %v349_v17 = vsub.s32 %v346_v15, %v277_v40 }
  0x41   :  { %v100_v26 = vadd.f32 %v99_v24, %v98_v22  ;;  %p520_p10 = pnand %p519_p9, %p513_p6 }
  0x42   :  { %v92_v27 = vrot.slane %v91_v25, 1 }
  0x43   :  { %v101_v28 = vrot.slane %v100_v26, 1 }
  0x44   :  { %v93_v29 = vadd.f32 %v92_v27, %v91_v25 }
  0x45   :  { %v102_v30 = vadd.f32 %v101_v28, %v100_v26 }
  0x46   :  { %v104_v31 = vmul.f32 0.0625, %v93_v29 }
  0x47   :  { %v105_v32 = vmul.f32 0.0625, %v102_v30 }
  0x49   :  { %v120_v33 = vsel %vm119_vm2, %v105_v32, %v104_v31 }
  0x4a   :  { %408 = vmatmul.mubr.msk.f32.vlgmr.msra.gmra.mxu0 %vm84_vm1, %v120_v33 }
  0xfe   :  { %v416_v34 = vpop.f32.mrf.mxu1 }
  0xff   :  { %v270_v58 = vadd.f32 %v416_v34, %v266_v46 }
 0x100   :  { %v251_v38 = vpop.f32.mrf.mxu1 }
 0x101   :  { %v268_v54 = vadd.f32 %v266_v46, %v251_v38 }
 0x102   :  { %v417_v42 = vpop.f32.mrf.mxu1 }
 0x103   :  { %v271_v61 = vadd.f32 %v417_v42, %v267_v48 }
 0x104   :  { %v254_v49 = vpop.f32.mrf.mxu1 }
 0x105   :  { %v269_v55 = vadd.f32 %v267_v48, %v254_v49 }
 0x10a   :  { %v189_v44 = vpop.f32.mrf.mxu0 }
 0x10b   :  { %v190_v45 = vadd.f32 %v383_v41, %v189_v44 }
 0x10c   :  { %v409_v47 = vpop.f32.mrf.mxu0 }
 0x10d   :  { %v279_v50 = vrot.slane %v190_v45, %v278_v43 }
 0x10f   :  { %v280_v52 = vcombine.high %v279_v50, %v279_v50  ;;  %v287_v53 = vrot.slane %v279_v50, %v278_v43 }
 0x111   :  { %v294_v56 = vrot.slane %v280_v52, %v278_v43  ;;  %v298_v57 = vrot.slane %v287_v53, %v297_v51 }
 0x113   :  { %v302_v59 = vrot.slane %v294_v56, %v297_v51  ;;  %v305_v60 = vadd.f32 %v298_v57, %v268_v54  ;;  %v306_v62 = vadd.f32 %v298_v57, %v269_v55 }
 0x115   :  { %v307_v0 = vadd.f32 %v302_v59, %v270_v58  ;;  %v309_v1 = vmax.f32 %v305_v60, 0.0  ;;  %v308_v2 = vadd.f32 %v302_v59, %v271_v61  ;;  %v310_v3 = vmax.f32 %v306_v62, 0.0 }
 0x117   :  { %v311_v4 = vmax.f32 %v307_v0, 0.0  ;;  %v312_v5 = vmax.f32 %v308_v2, 0.0  ;;  %v320_v6 = vmul.f32 %v389_v63, %v309_v1  ;;  %v321_v9 = vmul.f32 %v389_v63, %v310_v3 }
 0x119   :  { %v324_v7 = vsel %vm84_vm1, %v320_v6, 0.0  ;;  %v322_v8 = vmul.f32 %v389_v63, %v311_v4  ;;  %v323_v11 = vmul.f32 %v389_v63, %v312_v5  ;;  %v327_v12 = vsel %vm84_vm1, %v321_v9, 0.0 }
 0x11a   :  { %325 = vadd.xlane.f32.xlu0 %v324_v7 }
 0x11b   :  { %v330_v10 = vsel %vm84_vm1, %v322_v8, 0.0  ;;  %v333_v13 = vsel %vm84_vm1, %v323_v11, 0.0 }
 0x11c   :  { %331 = vadd.xlane.f32.xlu1 %v330_v10 }
 0x11e   :  { %328 = vadd.xlane.f32.xlu0 %v327_v12 }
 0x120   :  { %334 = vadd.xlane.f32.xlu1 %v333_v13 }
 0x1a3   :  { %v326_v16 = vpop.xlane.xlu0 %325 }
 0x1a4   :  { %v345_v23 = vrot.slane %v326_v16, %v344_v19 }
 0x1a5   :  { %v332_v18 = vpop.xlane.xlu1 %331 }
 0x1a6   :  { %v356_v24 = vrot.slane %v332_v18, %v344_v19 }
 0x1a7   :  { %v329_v20 = vpop.xlane.xlu0 %328 }
 0x1a8   :  { %v350_v21 = vrot.slane %v329_v20, %v349_v17 }
 0x1a9   :  { %v335_v22 = vpop.xlane.xlu1 %334 }
 0x1aa   :  { %v360_v25 = vrot.slane %v335_v22, %v349_v17  ;;  %v352_v26 = vsel %vm351_vm3, %v350_v21, %v345_v23 }
 0x1ac   :  { %v361_v27 = vsel %vm351_vm3, %v360_v25, %v356_v24 }
 0x1ad   :  { %v362_v28 = vsel %vm119_vm2, %v361_v27, %v352_v26 }
 0x1ae   :  { %365 = vst.msk [vmem:[#allocation10] sm:$0x3] %vm364_vm4, %v362_v28 }
 0x1af   :  { %523 = shalt.err (!%p520_p10)
}
 0x1b0   :  { %375 = dma.vmem_to_hbm [thread:$0]  %s373_s20, 32, %s636_s6, [#allocation4]  }
 0x1b1   :  { %538 = dma.done.wait [#allocation4], 32  }
 0x1b2   :  { %539 = vsyncadd [#allocation4], 4294967264 }
 0x1b3   :  { %379 = vsyncpa [#allocation3], 1 }
 0x1b4   :  { %380 = vsyncpa [#allocation6], 1 }
 0x1b5   :  { %381 = vsyncpa [#allocation9], 1 }
 0x1b6   :  { %382 = vsyncpa [#allocation4], 1 }

</bundles_post_ra>
